<compile_context>
chip_gen: v7x
topology: tpu7x:2x2x1
jax: 0.10.0
libtpu: 0.0.40
codegen_flags: <defaults>
</compile_context>

<pallas_src>
import jax
import jax.numpy as jnp
from jax.experimental import pallas as pl
from jax.experimental.pallas import tpu as pltpu


def _round_up(x, m):
    return (x + m - 1) // m * m


def _mlp_kernel(x_ref, w1_ref, wh_ref, b14_ref, w5_ref, b5_ref, o_ref):
    """Fused 5-layer MLP on one batch tile; weights stay VMEM-resident."""
    compute_dtype = w1_ref.dtype  # bf16 operands -> MXU-native on v6e/v7x

    def linear_relu(h, w, b):
        y = jnp.dot(h.astype(compute_dtype), w,
                    preferred_element_type=jnp.float32)
        y = y + b                    # (1, out) broadcasts over batch rows
        return jnp.maximum(y, 0.0)   # ReLU

    h = linear_relu(x_ref[...], w1_ref[...], b14_ref[0:1, :])
    # Dropout(p=0.3) -> identity in eval mode (after layers 1, 2, 3)
    for l in range(wh_ref.shape[0]):            # layers 2..4 (static unroll)
        h = linear_relu(h, wh_ref[l], b14_ref[l + 1:l + 2, :])
    h = linear_relu(h, w5_ref[...], b5_ref[...])  # final Linear + ReLU (padded lanes stay 0)
    o_ref[...] = h.astype(o_ref.dtype)


def prepare_params(params, compute_dtype=jnp.bfloat16, lane=128):
    """Cast / stack / lane-pad raw (in,out)-layout params into the kernel layout."""
    H = params["w1"].shape[1]
    O = params["w5"].shape[1]
    O_pad = _round_up(O, lane)
    w1 = params["w1"].astype(compute_dtype)
    wh = jnp.stack([params["w2"], params["w3"], params["w4"]]).astype(compute_dtype)
    b14 = jnp.concatenate([params[f"b{i}"] for i in range(1, 5)],
                          axis=0).astype(jnp.float32)
    w5p = jnp.zeros((H, O_pad), compute_dtype).at[:, :O].set(
        params["w5"].astype(compute_dtype))
    b5p = jnp.zeros((1, O_pad), jnp.float32).at[:, :O].set(
        params["b5"].astype(jnp.float32))
    return dict(w1=w1, wh=wh, b14=b14, w5p=w5p, b5p=b5p, out_size=O)


def mlp_forward(x, packed, *, batch_tile=None):
    """x: (B, D_in) float32. packed: output of prepare_params()."""
    B, D_in = x.shape
    H = packed["w1"].shape[1]
    O_pad = packed["w5p"].shape[1]
    O = packed["out_size"]
    compute_dtype = packed["w1"].dtype

    # Large tile: grid-step overhead dwarfs these matmuls. For tiny batches use
    # a single step; for production batches cap at 512 (>=85% of roofline in
    # measured sweeps) which also keeps >=2 parallel steps for v7x's 2 TCs.
    if batch_tile is None:
        batch_tile = min(B, 512)
    B_pad = _round_up(B, batch_tile)

    xc = x.astype(compute_dtype)
    if B_pad != B:
        xc = jnp.zeros((B_pad, D_in), compute_dtype).at[:B].set(xc)

    const2 = lambda shape: pl.BlockSpec(shape, lambda i: (0, 0))
    grid = (B_pad // batch_tile,)

    flops = 2 * B_pad * (D_in * H + 3 * H * H + H * O_pad)
    param_bytes = sum(int(v.size) * v.dtype.itemsize
                      for k, v in packed.items() if k != "out_size")
    bytes_accessed = int(xc.size) * xc.dtype.itemsize + param_bytes + B_pad * O_pad * 4

    out = pl.pallas_call(
        _mlp_kernel,
        out_shape=jax.ShapeDtypeStruct((B_pad, O_pad), jnp.float32),
        grid_spec=pltpu.PrefetchScalarGridSpec(
            num_scalar_prefetch=0,
            grid=grid,
            in_specs=[
                pl.BlockSpec((batch_tile, D_in), lambda i: (i, 0)),  # x tile
                const2((D_in, H)),                                   # w1
                pl.BlockSpec((3, H, H), lambda i: (0, 0, 0)),        # w2..w4 stacked
                const2((4, H)),                                      # b1..b4 stacked
                const2((H, O_pad)),                                  # w5 (lane-padded)
                const2((1, O_pad)),                                  # b5 (lane-padded)
            ],
            out_specs=pl.BlockSpec((batch_tile, O_pad), lambda i: (i, 0)),
        ),
        compiler_params=pltpu.CompilerParams(
            dimension_semantics=("parallel",)),
        cost_estimate=pl.CostEstimate(
            flops=flops, transcendentals=0, bytes_accessed=bytes_accessed),
    )(xc, packed["w1"], packed["wh"], packed["b14"],
      packed["w5p"], packed["b5p"])

    return out[:B, :O]


def init_params(key, input_size, hidden_size, output_size):
    """PyTorch-style uniform(-1/sqrt(fan_in), 1/sqrt(fan_in)) init.

    Weights are returned already transposed to (in, out); biases as (1, out)."""
    sizes = [(input_size, hidden_size),
             (hidden_size, hidden_size),
             (hidden_size, hidden_size),
             (hidden_size, hidden_size),
             (hidden_size, output_size)]
    params = {}
    keys = jax.random.split(key, 2 * len(sizes))
    for idx, (fan_in, fan_out) in enumerate(sizes):
        bound = 1.0 / (fan_in ** 0.5)
        params[f"w{idx + 1}"] = jax.random.uniform(
            keys[2 * idx], (fan_in, fan_out),
            minval=-bound, maxval=bound, dtype=jnp.float32)
        params[f"b{idx + 1}"] = jax.random.uniform(
            keys[2 * idx + 1], (1, fan_out),
            minval=-bound, maxval=bound, dtype=jnp.float32)
    return params


def mlp_reference_f32(x, params):
    """Pure-f32 eval-mode forward (PyTorch semantics)."""
    h = x
    for i in range(1, 6):
        h = jnp.maximum(h @ params[f"w{i}"] + params[f"b{i}"], 0.0)
    return h


def mlp_reference_mirror(x, params, compute_dtype=jnp.bfloat16):
    """Mirrors the kernel math exactly (bf16 operands, f32 accumulation)."""
    h = x
    for i in range(1, 6):
        y = jnp.dot(h.astype(compute_dtype),
                    params[f"w{i}"].astype(compute_dtype),
                    preferred_element_type=jnp.float32)
        h = jnp.maximum(y + params[f"b{i}"].astype(jnp.float32), 0.0)
    return h


if __name__ == "__main__":
    input_size, hidden_size, output_size = 32, 32, 16
    batch = 16

    key = jax.random.PRNGKey(0)
    k_x, k_p = jax.random.split(key)
    x = jax.random.normal(k_x, (batch, input_size), dtype=jnp.float32)
    params = init_params(k_p, input_size, hidden_size, output_size)
    packed = prepare_params(params)

    out = mlp_forward(x, packed)
    out = jax.block_until_ready(out)
    assert out.shape == (batch, output_size)

    # Exact-math mirror (same bf16/f32 mixed precision as the kernel).
    ref_mirror = mlp_reference_mirror(x, params)
    assert jnp.allclose(out, ref_mirror, atol=1e-4, rtol=1e-4), \
        "mismatch vs bf16-mirror reference"
    # Pure-f32 PyTorch-semantics reference (loose tolerance for bf16 operands).
    ref_f32 = mlp_reference_f32(x, params)
    assert jnp.allclose(out, ref_f32, atol=5e-2, rtol=5e-2), \
        "mismatch vs f32 reference"

    print("KERNEL_OK")
</pallas_src>

<mosaic_0001>
module attributes {stable_mosaic.version = 11 : i64} {
  func.func @_mlp_kernel(%arg0: i32, %arg1: memref<16x32xbf16, #tpu.memory_space<vmem>>, %arg2: memref<32x32xbf16, #tpu.memory_space<vmem>>, %arg3: memref<3x32x32xbf16, #tpu.memory_space<vmem>>, %arg4: memref<4x32xf32, #tpu.memory_space<vmem>>, %arg5: memref<32x128xbf16, #tpu.memory_space<vmem>>, %arg6: memref<1x128xf32, #tpu.memory_space<vmem>>, %arg7: memref<16x128xf32, #tpu.memory_space<vmem>>) attributes {dimension_semantics = [#tpu.dimension_semantics<parallel>], iteration_bounds = array<i64: 1>, scalar_prefetch = 0 : i64, scratch_operands = 0 : i64, tpu.core_type = #tpu.core_type<tc>, window_params = [{transform_indices = @transform_0, window_bounds = array<i64: 16, 32>}, {pipeline_mode = #tpu.pipeline_mode<synchronous>, transform_indices = @transform_1, window_bounds = array<i64: 32, 32>}, {pipeline_mode = #tpu.pipeline_mode<synchronous>, transform_indices = @transform_2, window_bounds = array<i64: 3, 32, 32>}, {pipeline_mode = #tpu.pipeline_mode<synchronous>, transform_indices = @transform_3, window_bounds = array<i64: 4, 32>}, {pipeline_mode = #tpu.pipeline_mode<synchronous>, transform_indices = @transform_4, window_bounds = array<i64: 32, 128>}, {pipeline_mode = #tpu.pipeline_mode<synchronous>, transform_indices = @transform_5, window_bounds = array<i64: 1, 128>}, {transform_indices = @transform_6, window_bounds = array<i64: 16, 128>}]} {
    %c0 = arith.constant 0 : index
    %c0_0 = arith.constant 0 : index
    %0 = vector.load %arg1[%c0, %c0_0] : memref<16x32xbf16, #tpu.memory_space<vmem>>, vector<16x32xbf16>
    %c0_1 = arith.constant 0 : index
    %c0_2 = arith.constant 0 : index
    %1 = vector.load %arg2[%c0_1, %c0_2] : memref<32x32xbf16, #tpu.memory_space<vmem>>, vector<32x32xbf16>
    %c0_3 = arith.constant 0 : index
    %c0_4 = arith.constant 0 : index
    %2 = vector.load %arg4[%c0_3, %c0_4] : memref<4x32xf32, #tpu.memory_space<vmem>>, vector<1x32xf32>
    %cst = arith.constant dense<0.000000e+00> : vector<16x32xf32>
    %3 = tpu.matmul %0, %1, %cst {dimension_numbers = #tpu.dot_dimension_numbers<[1], [0], [0], [1], [0, 0, 1, 1], [], []>} : vector<16x32xbf16>, vector<32x32xbf16>, vector<16x32xf32> -> vector<16x32xf32>
    %4 = vector.broadcast %2 : vector<1x32xf32> to vector<16x32xf32>
    %5 = arith.addf %3, %4 : vector<16x32xf32>
    %cst_5 = arith.constant 0.000000e+00 : f32
    %6 = vector.broadcast %cst_5 : f32 to vector<16x32xf32>
    %7 = arith.maximumf %5, %6 : vector<16x32xf32>
    %c0_6 = arith.constant 0 : index
    %c0_7 = arith.constant 0 : index
    %c0_8 = arith.constant 0 : index
    %8 = vector.load %arg3[%c0_6, %c0_7, %c0_8] : memref<3x32x32xbf16, #tpu.memory_space<vmem>>, vector<1x32x32xbf16>
    %9 = vector.shape_cast %8 : vector<1x32x32xbf16> to vector<32x32xbf16>
    %c1 = arith.constant 1 : index
    %c0_9 = arith.constant 0 : index
    %10 = vector.load %arg4[%c1, %c0_9] : memref<4x32xf32, #tpu.memory_space<vmem>>, vector<1x32xf32>
    %11 = arith.truncf %7 : vector<16x32xf32> to vector<16x32xbf16>
    %cst_10 = arith.constant dense<0.000000e+00> : vector<16x32xf32>
    %12 = tpu.matmul %11, %9, %cst_10 {dimension_numbers = #tpu.dot_dimension_numbers<[1], [0], [0], [1], [0, 0, 1, 1], [], []>} : vector<16x32xbf16>, vector<32x32xbf16>, vector<16x32xf32> -> vector<16x32xf32>
    %13 = vector.broadcast %10 : vector<1x32xf32> to vector<16x32xf32>
    %14 = arith.addf %12, %13 : vector<16x32xf32>
    %cst_11 = arith.constant 0.000000e+00 : f32
    %15 = vector.broadcast %cst_11 : f32 to vector<16x32xf32>
    %16 = arith.maximumf %14, %15 : vector<16x32xf32>
    %c1_12 = arith.constant 1 : index
    %c0_13 = arith.constant 0 : index
    %c0_14 = arith.constant 0 : index
    %17 = vector.load %arg3[%c1_12, %c0_13, %c0_14] : memref<3x32x32xbf16, #tpu.memory_space<vmem>>, vector<1x32x32xbf16>
    %18 = vector.shape_cast %17 : vector<1x32x32xbf16> to vector<32x32xbf16>
    %c2 = arith.constant 2 : index
    %c0_15 = arith.constant 0 : index
    %19 = vector.load %arg4[%c2, %c0_15] : memref<4x32xf32, #tpu.memory_space<vmem>>, vector<1x32xf32>
    %20 = arith.truncf %16 : vector<16x32xf32> to vector<16x32xbf16>
    %cst_16 = arith.constant dense<0.000000e+00> : vector<16x32xf32>
    %21 = tpu.matmul %20, %18, %cst_16 {dimension_numbers = #tpu.dot_dimension_numbers<[1], [0], [0], [1], [0, 0, 1, 1], [], []>} : vector<16x32xbf16>, vector<32x32xbf16>, vector<16x32xf32> -> vector<16x32xf32>
    %22 = vector.broadcast %19 : vector<1x32xf32> to vector<16x32xf32>
    %23 = arith.addf %21, %22 : vector<16x32xf32>
    %cst_17 = arith.constant 0.000000e+00 : f32
    %24 = vector.broadcast %cst_17 : f32 to vector<16x32xf32>
    %25 = arith.maximumf %23, %24 : vector<16x32xf32>
    %c2_18 = arith.constant 2 : index
    %c0_19 = arith.constant 0 : index
    %c0_20 = arith.constant 0 : index
    %26 = vector.load %arg3[%c2_18, %c0_19, %c0_20] : memref<3x32x32xbf16, #tpu.memory_space<vmem>>, vector<1x32x32xbf16>
    %27 = vector.shape_cast %26 : vector<1x32x32xbf16> to vector<32x32xbf16>
    %c3 = arith.constant 3 : index
    %c0_21 = arith.constant 0 : index
    %28 = vector.load %arg4[%c3, %c0_21] : memref<4x32xf32, #tpu.memory_space<vmem>>, vector<1x32xf32>
    %29 = arith.truncf %25 : vector<16x32xf32> to vector<16x32xbf16>
    %cst_22 = arith.constant dense<0.000000e+00> : vector<16x32xf32>
    %30 = tpu.matmul %29, %27, %cst_22 {dimension_numbers = #tpu.dot_dimension_numbers<[1], [0], [0], [1], [0, 0, 1, 1], [], []>} : vector<16x32xbf16>, vector<32x32xbf16>, vector<16x32xf32> -> vector<16x32xf32>
    %31 = vector.broadcast %28 : vector<1x32xf32> to vector<16x32xf32>
    %32 = arith.addf %30, %31 : vector<16x32xf32>
    %cst_23 = arith.constant 0.000000e+00 : f32
    %33 = vector.broadcast %cst_23 : f32 to vector<16x32xf32>
    %34 = arith.maximumf %32, %33 : vector<16x32xf32>
    %c0_24 = arith.constant 0 : index
    %c0_25 = arith.constant 0 : index
    %35 = vector.load %arg5[%c0_24, %c0_25] : memref<32x128xbf16, #tpu.memory_space<vmem>>, vector<32x128xbf16>
    %c0_26 = arith.constant 0 : index
    %c0_27 = arith.constant 0 : index
    %36 = vector.load %arg6[%c0_26, %c0_27] : memref<1x128xf32, #tpu.memory_space<vmem>>, vector<1x128xf32>
    %37 = arith.truncf %34 : vector<16x32xf32> to vector<16x32xbf16>
    %cst_28 = arith.constant dense<0.000000e+00> : vector<16x128xf32>
    %38 = tpu.matmul %37, %35, %cst_28 {dimension_numbers = #tpu.dot_dimension_numbers<[1], [0], [0], [1], [0, 0, 1, 1], [], []>} : vector<16x32xbf16>, vector<32x128xbf16>, vector<16x128xf32> -> vector<16x128xf32>
    %39 = vector.broadcast %36 : vector<1x128xf32> to vector<16x128xf32>
    %40 = arith.addf %38, %39 : vector<16x128xf32>
    %cst_29 = arith.constant 0.000000e+00 : f32
    %41 = vector.broadcast %cst_29 : f32 to vector<16x128xf32>
    %42 = arith.maximumf %40, %41 : vector<16x128xf32>
    %c0_30 = arith.constant 0 : index
    %c0_31 = arith.constant 0 : index
    %43 = vector.load %arg7[%c0_30, %c0_31] : memref<16x128xf32, #tpu.memory_space<vmem>>, vector<16x128xf32>
    tpu.vector_store %arg7[%c0_30, %c0_31], %42 {strides = array<i32>} : memref<16x128xf32, #tpu.memory_space<vmem>>, vector<16x128xf32>,
    return
  }
  func.func @transform_0(%arg0: i32) -> (i32, i32) {
    %c0_i32 = arith.constant 0 : i32
    %c0_i32_0 = arith.constant 0 : i32
    return %arg0, %c0_i32 : i32, i32
  }
  func.func @transform_1(%arg0: i32) -> (i32, i32) {
    %c0_i32 = arith.constant 0 : i32
    %c0_i32_0 = arith.constant 0 : i32
    %c0_i32_1 = arith.constant 0 : i32
    return %c0_i32, %c0_i32_0 : i32, i32
  }
  func.func @transform_2(%arg0: i32) -> (i32, i32, i32) {
    %c0_i32 = arith.constant 0 : i32
    %c0_i32_0 = arith.constant 0 : i32
    %c0_i32_1 = arith.constant 0 : i32
    %c0_i32_2 = arith.constant 0 : i32
    return %c0_i32, %c0_i32_0, %c0_i32_1 : i32, i32, i32
  }
  func.func @transform_3(%arg0: i32) -> (i32, i32) {
    %c0_i32 = arith.constant 0 : i32
    %c0_i32_0 = arith.constant 0 : i32
    %c0_i32_1 = arith.constant 0 : i32
    return %c0_i32, %c0_i32_0 : i32, i32
  }
  func.func @transform_4(%arg0: i32) -> (i32, i32) {
    %c0_i32 = arith.constant 0 : i32
    %c0_i32_0 = arith.constant 0 : i32
    %c0_i32_1 = arith.constant 0 : i32
    return %c0_i32, %c0_i32_0 : i32, i32
  }
  func.func @transform_5(%arg0: i32) -> (i32, i32) {
    %c0_i32 = arith.constant 0 : i32
    %c0_i32_0 = arith.constant 0 : i32
    %c0_i32_1 = arith.constant 0 : i32
    return %c0_i32, %c0_i32_0 : i32, i32
  }
  func.func @transform_6(%arg0: i32) -> (i32, i32) {
    %c0_i32 = arith.constant 0 : i32
    %c0_i32_0 = arith.constant 0 : i32
    return %arg0, %c0_i32 : i32, i32
  }
}

</mosaic_0001>

<bundles_post_ra>
// kernel: tpu_custom_call.1
= control target key start
LH: loop header
LB: loop body
LE: loop exit
PB: predicated region body
PF: predicated region fallthrough
CT: control target
= control target key end

     0   :  { %11 = vsyncpa [#allocation3], 0  ;;  %s840_s0 = inlined_call_operand.hbm [shape: bf16[16,32], index: 0, kind: input, shape index: {}]   ;;  %s841_s1 = inlined_call_operand.hbm [shape: bf16[32,32], index: 1, kind: input, shape index: {}]   ;;  %s842_s2 = inlined_call_operand.hbm [shape: bf16[3,32,32], index: 2, kind: input, shape index: {}]   ;;  %s843_s3 = inlined_call_operand.vmem [shape: f32[4,32], index: 3, kind: input, shape index: {}]   ;;  %s844_s4 = inlined_call_operand.hbm [shape: bf16[32,128], index: 4, kind: input, shape index: {}]   ;;  %s845_s5 = inlined_call_operand.vmem [shape: f32[1,128], index: 5, kind: input, shape index: {}]   ;;  %s846_s6 = inlined_call_operand.hbm [shape: f32[16,128], index: 6, kind: output, shape index: {}]  }
   0x1   :  { %12 = vsyncpa [#allocation6], 0 }
   0x2   :  { %13 = vsyncpa [#allocation9], 0 }
   0x3   :  { %14 = vsyncpa [#allocation4], 0  ;;  %s668_s21 = smov [#allocation5]   ;;  %s669_s23 = smov [#allocation2]  }
   0x4   :  { %s32_s22 = sshll.u32 %s668_s21, 4  ;;  %s20_s24 = sshll.u32 %s669_s23, 4  ;;  %s33_s22 = int_to_ptr.vmem [resolvable:$true] %s32_s22  ;;  %s714_s24 = int_to_ptr.vmem [resolvable:$true] %s20_s24 }
   0x5   :  { %s550_s27 = scalar_lea.hbm %s841_s1, 256 }
   0x6   :  { %p551_p0 = scmp.ne.s32.totalorder %s841_s1, %s550_s27  ;;  %p554_p1 = scmp.lt.u32.totalorder %s550_s27, %s841_s1 }
   0x8   :  { %p556_p2 = pnand %p554_p1, %p551_p0 }
   0xa   :  { %559 = shalt.err (!%p556_p2)
}
   0xb   :  { %s560_s8 = scalar_lea.vmem %s33_s22, 256  ;;  %p565_p4 = scmp.lt.s32.totalorder %s33_s22, %s33_s22 }
   0xc   :  { %p561_p3 = scmp.ne.s32.totalorder %s33_s22, %s560_s8  ;;  %p566_p5 = scmp.lt.s32.totalorder %s560_s8, %s560_s8 }
   0xe   :  { %p567_p6 = por %p566_p5, %p565_p4 }
  0x10   :  { %p568_p7 = pnand %p567_p6, %p561_p3 }
  0x12   :  { %571 = shalt.err (!%p568_p7)
}
  0x13   :  { %s670_s9 = smov 64   ;;  %s671_s10 = smov 4  }
  0x14   :  { %38 = dma.hbm_to_vmem [thread:$0]  %s841_s1, 256, %s33_s22, [#allocation6], %s670_s9, %s670_s9, %s671_s10  }
  0x15   :  { %s572_s15 = scalar_lea.hbm %s840_s0, 128 }
  0x16   :  { %p573_p8 = scmp.ne.s32.totalorder %s840_s0, %s572_s15  ;;  %p576_p9 = scmp.lt.u32.totalorder %s572_s15, %s840_s0 }
  0x18   :  { %p578_p10 = pnand %p576_p9, %p573_p8 }
  0x1a   :  { %581 = shalt.err (!%p578_p10)
}
  0x1b   :  { %s582_s20 = scalar_lea.vmem %s714_s24, 128  ;;  %p587_p12 = scmp.lt.s32.totalorder %s714_s24, %s714_s24 }
  0x1c   :  { %p583_p11 = scmp.ne.s32.totalorder %s714_s24, %s582_s20  ;;  %p588_p13 = scmp.lt.s32.totalorder %s582_s20, %s582_s20 }
  0x1e   :  { %p589_p0 = por %p588_p13, %p587_p12 }
  0x20   :  { %p590_p1 = pnand %p589_p0, %p583_p11 }
  0x22   :  { %593 = shalt.err (!%p590_p1)
}
  0x23   :  { %26 = dma.hbm_to_vmem [thread:$0]  %s840_s0, 128, %s714_s24, [#allocation3], %s670_s9, %s670_s9, %s671_s10  }
  0x24   :  { %s672_s22 = smov [#allocation7]   ;;  %s673_s25 = smov [#allocation8]  }
  0x25   :  { %s44_s23 = sshll.u32 %s672_s22, 4  ;;  %s58_s26 = sshll.u32 %s673_s25, 4  ;;  %s45_s23 = int_to_ptr.vmem [resolvable:$true] %s44_s23  ;;  %s751_s26 = int_to_ptr.vmem [resolvable:$true] %s58_s26 }
  0x26   :  { %s594_s29 = scalar_lea.hbm %s842_s2, 768 }
  0x27   :  { %p595_p2 = scmp.ne.s32.totalorder %s842_s2, %s594_s29  ;;  %p598_p3 = scmp.lt.u32.totalorder %s594_s29, %s842_s2 }
  0x29   :  { %p600_p4 = pnand %p598_p3, %p595_p2 }
  0x2b   :  { %603 = shalt.err (!%p600_p4)
}
  0x2c   :  { %s604_s0 = scalar_lea.vmem %s45_s23, 768  ;;  %p609_p6 = scmp.lt.s32.totalorder %s45_s23, %s45_s23 }
  0x2d   :  { %p605_p5 = scmp.ne.s32.totalorder %s45_s23, %s604_s0  ;;  %p610_p7 = scmp.lt.s32.totalorder %s604_s0, %s604_s0 }
  0x2f   :  { %p611_p8 = por %p610_p7, %p609_p6 }
  0x31   :  { %p612_p9 = pnand %p611_p8, %p605_p5 }
  0x33   :  { %615 = shalt.err (!%p612_p9)
}
  0x34   :  { %50 = dma.hbm_to_vmem [thread:$0]  %s842_s2, 768, %s45_s23, [#allocation6], %s670_s9, %s670_s9, %s671_s10  }
  0x35   :  { %s616_s15 = scalar_lea.hbm %s844_s4, 256 }
  0x36   :  { %p617_p10 = scmp.ne.s32.totalorder %s844_s4, %s616_s15  ;;  %p620_p11 = scmp.lt.u32.totalorder %s616_s15, %s844_s4 }
  0x38   :  { %p622_p12 = pnand %p620_p11, %p617_p10 }
  0x3a   :  { %625 = shalt.err (!%p622_p12)
}
  0x3b   :  { %s626_s20 = scalar_lea.vmem %s751_s26, 256  ;;  %p631_p0 = scmp.lt.s32.totalorder %s751_s26, %s751_s26 }
  0x3c   :  { %p627_p13 = scmp.ne.s32.totalorder %s751_s26, %s626_s20  ;;  %p632_p1 = scmp.lt.s32.totalorder %s626_s20, %s626_s20 }
  0x3e   :  { %p633_p2 = por %p632_p1, %p631_p0 }
  0x40   :  { %p634_p3 = pnand %p633_p2, %p627_p13 }
  0x42   :  { %637 = shalt.err (!%p634_p3)
}
  0x43   :  { %64 = dma.hbm_to_vmem [thread:$0]  %s844_s4, 256, %s751_s26, [#allocation9], %s670_s9, %s670_s9, %s671_s10  }
  0x44   :  { %660 = dma.done.wait [#allocation3], 128  }
  0x45   :  { %661 = vsyncadd [#allocation3], 4294967168 }
  0x46   :  { %662 = dma.done.wait [#allocation6], 1024  }
  0x47   :  { %663 = vsyncadd [#allocation6], 4294966272 }
  0x48   :  { %664 = dma.done.wait [#allocation9], 256  }
  0x49   :  { %665 = vsyncadd [#allocation9], 4294967040  ;;  %v674_v0 = vmov 0.0   ;;  %vm675_vm0 = vmmov 0   ;;  %v539_v1 = vld [vmem:[#allocation5] sm:$0xff]   ;;  %v540_v2 = vld [vmem:[#allocation5 + $0x8] sm:$0xff]  }
  0x4a   :  { %488 = vmatprep.subr.bf16.mxu0 %v674_v0  ;;  %492 = vmatprep.mubr.msk.bf16.mxu0 %vm675_vm0, %v674_v0  ;;  %v541_v3 = vld [vmem:[#allocation2] sm:$0xff]   ;;  %vm108_vm1 = vcmask 261120   ;;  %v542_v4 = vld [vmem:[#allocation7] sm:$0xff]   ;;  %v544_v16 = vld [vmem:[#allocation7 + $0x10] sm:$0xff]   ;;  %s676_s29 = smov [#allocation10]  }
  0x4b   :  { %496 = vmatprep.subr.bf16.mxu1 %v674_v0  ;;  %500 = vmatprep.mubr.msk.bf16.mxu1 %vm675_vm0, %v674_v0  ;;  %v543_v5 = vld [vmem:[#allocation7 + $0x8] sm:$0xff]   ;;  %v545_v17 = vld [vmem:[#allocation7 + $0x18] sm:$0xff]   ;;  %v546_v28 = vld [vmem:[#allocation7 + $0x20] sm:$0xff]  }
  0x4c   :  { %489 = vmatpush3.bf16.msra.mxu0 %v539_v1  ;;  %497 = vmatpush3.bf16.msra.mxu1 %v542_v4  ;;  %v452_v6 = vld [vmem:[%s843_s3] ss:$0 sm:$0xff]  ;;  %v457_v18 = vld [vmem:[%s843_s3 + $0x1] ss:$0 sm:$0xff]  ;;  %v461_v30 = vld [vmem:[%s843_s3 + $0x2] ss:$0 sm:$0xff] }
  0x4d   :  { %490 = vmatprep.subr.bf16.mxu0 %v674_v0  ;;  %498 = vmatprep.subr.bf16.mxu1 %v674_v0  ;;  %v547_v29 = vld [vmem:[#allocation7 + $0x28] sm:$0xff]   ;;  %v548_v40 = vld [vmem:[#allocation8] sm:$0xff]   ;;  %v549_v41 = vld [vmem:[#allocation8 + $0x8] sm:$0xff]  }
  0x4e   :  { %v465_v42 = vld [vmem:[%s843_s3 + $0x3] ss:$0 sm:$0xff]  ;;  %v469_v52 = vld [vmem:[%s845_s5] ss:$0 sm:$0xff]  ;;  %s438_s3 = sshll.u32 %s676_s29, 4  ;;  %s439_s3 = int_to_ptr.vmem [resolvable:$true] %s438_s3 }
  0x4f   :  { %s638_s30 = scalar_lea.vmem %s439_s3, 256  ;;  %p643_p5 = scmp.lt.s32.totalorder %s439_s3, %s439_s3 }
  0x50   :  { %491 = vmatpush3.bf16.msra.mxu0 %v540_v2  ;;  %499 = vmatpush3.bf16.msra.mxu1 %v543_v5  ;;  %p639_p4 = scmp.ne.s32.totalorder %s439_s3, %s638_s30  ;;  %p644_p6 = scmp.lt.s32.totalorder %s638_s30, %s638_s30 }
  0x51   :  { %504 = vmatprep.subr.bf16.mxu0 %v674_v0  ;;  %512 = vmatprep.subr.bf16.mxu1 %v674_v0 }
  0x52   :  { %p645_p7 = por %p644_p6, %p643_p5 }
  0x53   :  { %493 = vmatmul.mubr.msk.bf16.vlgmr.msra.gmra.mrb[0].mxu0 %vm108_vm1, %v541_v3 }
  0x54   :  { %508 = vmatprep.mubr.msk.bf16.mxu0 %vm675_vm0, %v674_v0  ;;  %505 = vmatpush3.bf16.msra.mxu0 %v544_v16  ;;  %p646_p8 = pnand %p645_p7, %p639_p4 }
  0x55   :  { %506 = vmatprep.subr.bf16.mxu0 %v674_v0 }
  0x58   :  { %507 = vmatpush3.bf16.msra.mxu0 %v545_v17 }
  0x59   :  { %520 = vmatprep.subr.bf16.mxu0 %v674_v0 }
 0x126   :  { %v146_v7 = vpop.f32.mrb[0].mxu0 }
 0x127   :  { %v147_v8 = vadd.f32 %v452_v6, %v146_v7  ;;  %v494_v9 = vpop.f32.mrb[1].mxu0 }
 0x128   :  { %v149_v10 = vpop.f32.mrb[2].mxu0 }
 0x129   :  { %v150_v11 = vadd.f32 %v452_v6, %v149_v10  ;;  %v495_v12 = vpop.f32.mrb[3].mxu0  ;;  %v153_v13 = vmax.f32 %v147_v8, 0.0 }
 0x12b   :  { %v154_v14 = vmax.f32 %v150_v11, 0.0 }
 0x12d   :  { %v160_v15 = vpack.c.bf16 %v154_v14, %v153_v13 }
 0x12f   :  { %501 = vmatmul.mubr.msk.bf16.vlgmr.msra.gmra.mrb[0].mxu1 %vm108_vm1, %v160_v15 }
 0x130   :  { %516 = vmatprep.mubr.msk.bf16.mxu1 %vm675_vm0, %v674_v0  ;;  %513 = vmatpush3.bf16.msra.mxu1 %v546_v28 }
 0x131   :  { %514 = vmatprep.subr.bf16.mxu1 %v674_v0 }
 0x134   :  { %515 = vmatpush3.bf16.msra.mxu1 %v547_v29 }
 0x202   :  { %v214_v19 = vpop.f32.mrb[0].mxu1 }
 0x203   :  { %v215_v20 = vadd.f32 %v457_v18, %v214_v19  ;;  %v502_v21 = vpop.f32.mrb[1].mxu1 }
 0x204   :  { %v217_v22 = vpop.f32.mrb[2].mxu1 }
 0x205   :  { %v218_v23 = vadd.f32 %v457_v18, %v217_v22  ;;  %v503_v24 = vpop.f32.mrb[3].mxu1  ;;  %v221_v25 = vmax.f32 %v215_v20, 0.0 }
 0x207   :  { %v222_v26 = vmax.f32 %v218_v23, 0.0 }
 0x209   :  { %v229_v27 = vpack.c.bf16 %v222_v26, %v221_v25 }
 0x20b   :  { %509 = vmatmul.mubr.msk.bf16.vlgmr.msra.gmra.mrb[4].mxu0 %vm108_vm1, %v229_v27 }
 0x20c   :  { %524 = vmatprep.mubr.msk.bf16.mxu0 %vm675_vm0, %v674_v0  ;;  %521 = vmatpush3.bf16.msra.mxu0 %v548_v40 }
 0x20d   :  { %522 = vmatprep.subr.bf16.mxu0 %v674_v0 }
 0x210   :  { %523 = vmatpush3.bf16.msra.mxu0 %v549_v41 }
 0x2de   :  { %v283_v31 = vpop.f32.mrb[4].mxu0 }
 0x2df   :  { %v284_v32 = vadd.f32 %v461_v30, %v283_v31  ;;  %v510_v33 = vpop.f32.mrb[5].mxu0 }
 0x2e0   :  { %v286_v34 = vpop.f32.mrb[6].mxu0 }
 0x2e1   :  { %v287_v35 = vadd.f32 %v461_v30, %v286_v34  ;;  %v511_v36 = vpop.f32.mrb[7].mxu0  ;;  %v290_v37 = vmax.f32 %v284_v32, 0.0 }
 0x2e3   :  { %v291_v38 = vmax.f32 %v287_v35, 0.0 }
 0x2e5   :  { %v298_v39 = vpack.c.bf16 %v291_v38, %v290_v37 }
 0x2e7   :  { %517 = vmatmul.mubr.msk.bf16.vlgmr.msra.gmra.mrb[4].mxu1 %vm108_vm1, %v298_v39 }
 0x3ba   :  { %v352_v43 = vpop.f32.mrb[4].mxu1 }
 0x3bb   :  { %v353_v44 = vadd.f32 %v465_v42, %v352_v43  ;;  %v518_v45 = vpop.f32.mrb[5].mxu1 }
 0x3bc   :  { %v355_v46 = vpop.f32.mrb[6].mxu1 }
 0x3bd   :  { %v356_v47 = vadd.f32 %v465_v42, %v355_v46  ;;  %v519_v48 = vpop.f32.mrb[7].mxu1  ;;  %v359_v49 = vmax.f32 %v353_v44, 0.0 }
 0x3bf   :  { %v360_v50 = vmax.f32 %v356_v47, 0.0 }
 0x3c1   :  { %v366_v51 = vpack.c.bf16 %v360_v50, %v359_v49 }
 0x3c3   :  { %525 = vmatmul.mubr.msk.bf16.vlgmr.msra.gmra.mrb[8].mxu0 %vm108_vm1, %v366_v51 }
 0x496   :  { %v422_v53 = vpop.f32.mrb[8].mxu0 }
 0x497   :  { %v423_v54 = vadd.f32 %v469_v52, %v422_v53  ;;  %v526_v55 = vpop.f32.mrb[9].mxu0 }
 0x498   :  { %v425_v56 = vpop.f32.mrb[10].mxu0 }
 0x499   :  { %v429_v57 = vmax.f32 %v423_v54, 0.0  ;;  %v426_v58 = vadd.f32 %v469_v52, %v425_v56  ;;  %v527_v59 = vpop.f32.mrb[11].mxu0 }
 0x49b   :  { %431 = vst [vmem:[#allocation10] sm:$0xff] %v429_v57  ;;  %v430_v60 = vmax.f32 %v426_v58, 0.0 }
 0x49d   :  { %432 = vst [vmem:[#allocation10 + $0x8] sm:$0xff] %v430_v60 }
 0x49e   :  { %649 = shalt.err (!%p646_p8)
}
 0x49f   :  { %s650_s8 = scalar_lea.hbm %s846_s6, 256 }
 0x4a0   :  { %p651_p9 = scmp.ne.s32.totalorder %s846_s6, %s650_s8  ;;  %p654_p10 = scmp.lt.u32.totalorder %s650_s8, %s846_s6 }
 0x4a2   :  { %p656_p11 = pnand %p654_p10, %p651_p9 }
 0x4a4   :  { %659 = shalt.err (!%p656_p11)
}
 0x4a5   :  { %s677_s13 = smov 128   ;;  %s678_s14 = smov 8  }
 0x4a6   :  { %444 = dma.vmem_to_hbm [thread:$0]  %s439_s3, 256, %s846_s6, [#allocation4], %s677_s13, %s677_s13, %s678_s14  }
 0x4a7   :  { %666 = dma.done.wait [#allocation4], 256  }
 0x4a8   :  { %667 = vsyncadd [#allocation4], 4294967040 }
 0x4a9   :  { %448 = vsyncpa [#allocation3], 1 }
 0x4aa   :  { %449 = vsyncpa [#allocation6], 1 }
 0x4ab   :  { %450 = vsyncpa [#allocation9], 1 }
 0x4ac   :  { %451 = vsyncpa [#allocation4], 1 }

</bundles_post_ra>
